<compile_context>
chip_gen: v7x
topology: tpu7x:2x2x1
jax: 0.10.0
libtpu: 0.0.40
codegen_flags: <defaults>
</compile_context>

<pallas_src>
import functools
import math

import jax
import jax.numpy as jnp
from jax.experimental import pallas as pl
from jax.experimental.pallas import tpu as pltpu


_LANE = 128
_SUBLANE_BYTES = 32  # rows per vreg sublane group = 32 // itemsize (8 f32, 16 bf16, 32 i8)


# ----------------------------------------------------------------------------- kernels

def _combine_aligned_kernel(w0_ref, xp_ref, xs_ref, o_ref, *, private_size, shared_size):
    """P % 128 == 0: both slice stores start on a lane-group boundary (unmasked vst
    when shared_size is also a multiple of 128)."""
    scaled = (xp_ref[...] * w0_ref[...]).astype(o_ref.dtype)        # (bm, P) * (1, P)
    o_ref[:, :private_size] = scaled
    o_ref[:, private_size:private_size + shared_size] = xs_ref[...].astype(o_ref.dtype)


def _combine_concat_kernel(w0_ref, xp_ref, xs_ref, o_ref):
    """P % 128 != 0: build the concatenated row in VMEM (XLU lane shift) and do a
    single offset-0 full-block store instead of a misaligned slice store."""
    scaled = (xp_ref[...] * w0_ref[...]).astype(o_ref.dtype)
    o_ref[...] = jnp.concatenate([scaled, xs_ref[...].astype(o_ref.dtype)], axis=-1)


def _scale_only_kernel(w0_ref, xp_ref, o_ref):
    """x_shared is None: out = w0 * x_private."""
    o_ref[...] = (xp_ref[...] * w0_ref[...]).astype(o_ref.dtype)


# ----------------------------------------------------------------------------- helpers

def _cdiv(a, b):
    return -(-a // b)


def _row_alignment(*dtypes):
    """Sublane alignment for the second-to-last block dim, per the strictest dtype."""
    return max(_SUBLANE_BYTES // jnp.dtype(d).itemsize for d in dtypes)


def _pick_block_rows(M, out_row_bytes, row_align, *, target_block_bytes, min_split_bytes):
    """Byte-budgeted row block.

    - Output block targets ~target_block_bytes (the measured ~85% HBM-roofline
      plateau); double-buffered in+out VMEM stays ~4x that, under every chip's
      scoped-VMEM default, so no vmem_limit_bytes override is needed.
    - Once the problem exceeds min_split_bytes the grid is forced to >=2 near-equal
      blocks so v7x megacore can shard the row axis across both TensorCores.
    - Result is a multiple of row_align, or the full extent M.
    """
    total_bytes = M * out_row_bytes
    nblocks = _cdiv(total_bytes, max(target_block_bytes, 1))
    if total_bytes >= min_split_bytes:
        nblocks = max(nblocks, 2)
    nblocks = max(nblocks, 1)
    bm = _cdiv(_cdiv(M, nblocks), row_align) * row_align
    return M if bm >= M else bm


# ----------------------------------------------------------------------------- wrapper

def combine_representation(w0, x_private, x_shared=None, *,
                           target_block_bytes=1 << 20,    # ~1 MiB output block
                           min_split_bytes=256 << 10,     # split >=2 blocks above this
                           min_pallas_bytes=1 << 20,      # tiny inputs: let XLA fuse
                           input_buffer_count=2,          # set 3 to sweep pl.Buffered(3)
                           w0_compute_dtype=None):        # e.g. jnp.bfloat16 on v6e/v7x
    """Pallas implementation of CombineRepresentation.forward (dim=-1).

    x_private: (..., P), x_shared: (..., H) with matching leading dims (or None).
    Returns (..., P+H) (or (..., P) when x_shared is None); dtype follows
    torch-style promotion of (w0, x_private[, x_shared]).
    """
    P = x_private.shape[-1]
    assert w0.shape == (P,), f"w0 must be ({P},), got {w0.shape}"
    lead = x_private.shape[:-1]
    M = math.prod(lead) if lead else 1

    if w0_compute_dtype is not None:
        w0 = w0.astype(w0_compute_dtype)   # do NOT pre-scale x_private in the wrapper

    scaled_dtype = jnp.promote_types(w0.dtype, x_private.dtype)
    if x_shared is None:
        out_dtype = scaled_dtype
    else:
        assert x_shared.shape[:-1] == lead, "x_shared leading dims must match x_private"
        H = x_shared.shape[-1]
        out_dtype = jnp.promote_types(scaled_dtype, x_shared.dtype)

    # Tiny-input fast path: a handful of vregs does not amortize pallas_call launch
    # + per-grid-step overhead; XLA fuses the scale+concat into neighbouring ops.
    in_bytes = x_private.size * x_private.dtype.itemsize
    if x_shared is not None:
        in_bytes += x_shared.size * x_shared.dtype.itemsize
    if in_bytes < min_pallas_bytes:
        w0_b = w0.reshape((1,) * len(lead) + (P,))
        scaled = (w0_b * x_private).astype(out_dtype)
        if x_shared is None:
            return scaled
        return jnp.concatenate([scaled, x_shared.astype(out_dtype)], axis=-1)

    # ---------------- Pallas path: flatten leading dims, tile over rows ----------------
    xp2 = x_private.reshape(M, P)
    w0_2d = w0.reshape(1, P)

    if x_shared is None:
        dtypes = (x_private.dtype, out_dtype)
        out_cols = P
    else:
        xs2 = x_shared.reshape(M, H)
        dtypes = (x_private.dtype, x_shared.dtype, out_dtype)
        out_cols = P + H

    row_align = _row_alignment(*dtypes)
    bm = _pick_block_rows(M, out_cols * jnp.dtype(out_dtype).itemsize, row_align,
                          target_block_bytes=target_block_bytes,
                          min_split_bytes=min_split_bytes)
    grid = (_cdiv(M, bm),)
    params = pltpu.CompilerParams(dimension_semantics=("parallel",))

    def in_spec(cols):
        kw = {}
        if input_buffer_count != 2:          # default 2-deep pipeline unless swept
            kw["pipeline_mode"] = pl.Buffered(input_buffer_count)
        return pl.BlockSpec((bm, cols), lambda i: (i, 0), **kw)

    w0_spec = pl.BlockSpec((1, P), lambda i: (0, 0))   # resident: DMA'd once, reused

    if x_shared is None:
        out = pl.pallas_call(
            _scale_only_kernel,
            out_shape=jax.ShapeDtypeStruct((M, P), out_dtype),
            grid=grid,
            in_specs=[w0_spec, in_spec(P)],
            out_specs=pl.BlockSpec((bm, P), lambda i: (i, 0)),
            compiler_params=params,
        )(w0_2d, xp2)
        return out.reshape(lead + (P,))

    if P % _LANE == 0:
        kernel = functools.partial(_combine_aligned_kernel, private_size=P, shared_size=H)
    else:
        # TODO(synk): consumers that tolerate a padded layout could take P padded to a
        # multiple of 128 so both stores stay unmasked for arbitrary private_size.
        kernel = _combine_concat_kernel

    out = pl.pallas_call(
        kernel,
        out_shape=jax.ShapeDtypeStruct((M, P + H), out_dtype),
        grid=grid,
        in_specs=[w0_spec, in_spec(P), in_spec(H)],
        out_specs=pl.BlockSpec((bm, P + H), lambda i: (i, 0)),
        compiler_params=params,
    )(w0_2d, xp2, xs2)
    return out.reshape(lead + (P + H,))


def init_w0(key, private_size, mean=0.1, std=0.01):
    """ModelUtil.learnable_normal((private_size,), mean, std), clamped to [0, 1]."""
    w0 = mean + std * jax.random.normal(key, (private_size,), dtype=jnp.float32)
    return jnp.clip(w0, 0.0, 1.0)


if __name__ == "__main__":
    # Small, lane-friendly module shapes: batch=2, seq=8, private=128, shared=128.
    B, S, P, H = 2, 8, 128, 128

    key = jax.random.PRNGKey(0)
    k_w0, k_priv, k_shared = jax.random.split(key, 3)

    w0 = init_w0(k_w0, P)
    x_private = jax.random.normal(k_priv, (B, S, P), dtype=jnp.float32)
    x_shared = jax.random.normal(k_shared, (B, S, H), dtype=jnp.float32)

    # 1) Concat path through the Pallas kernel (force it despite the tiny size).
    out = jax.block_until_ready(
        combine_representation(w0, x_private, x_shared, min_pallas_bytes=0))
    ref = jnp.concatenate([w0[None, None, :] * x_private, x_shared], axis=-1)
    assert out.shape == (B, S, P + H)
    assert jnp.allclose(out, ref, atol=1e-6, rtol=1e-6)

    # 2) x_shared=None path through the Pallas kernel.
    out2 = jax.block_until_ready(
        combine_representation(w0, x_private, None, min_pallas_bytes=0))
    ref2 = w0[None, None, :] * x_private
    assert jnp.allclose(out2, ref2, atol=1e-6, rtol=1e-6)

    # 3) Larger input: exceeds the default min_pallas_bytes -> Pallas path with a
    #    balanced row grid (M = 4*300 = 1200 rows -> 2 blocks of 600 rows each).
    B2, S2 = 4, 300
    xp_big = jax.random.normal(jax.random.PRNGKey(1), (B2, S2, P), dtype=jnp.float32)
    xs_big = jax.random.normal(jax.random.PRNGKey(2), (B2, S2, H), dtype=jnp.float32)
    out3 = jax.block_until_ready(combine_representation(w0, xp_big, xs_big))
    ref3 = jnp.concatenate([w0[None, None, :] * xp_big, xs_big], axis=-1)
    assert out3.shape == (B2, S2, P + H)
    assert jnp.allclose(out3, ref3, atol=1e-6, rtol=1e-6)

    # 4) Tiny misaligned-width case (P=96, H=64): below min_pallas_bytes, so it takes
    #    the XLA fuse fast path (pallas launch overhead would dominate at this size).
    P4, H4 = 96, 64
    w0_4 = init_w0(jax.random.PRNGKey(3), P4)
    xp4 = jax.random.normal(jax.random.PRNGKey(4), (B, S, P4), dtype=jnp.float32)
    xs4 = jax.random.normal(jax.random.PRNGKey(5), (B, S, H4), dtype=jnp.float32)
    out4 = jax.block_until_ready(combine_representation(w0_4, xp4, xs4))
    ref4 = jnp.concatenate([w0_4[None, None, :] * xp4, xs4], axis=-1)
    assert out4.shape == (B, S, P4 + H4)
    assert jnp.allclose(out4, ref4, atol=1e-6, rtol=1e-6)

    print("KERNEL_OK")
</pallas_src>

<mosaic_0001>
module attributes {stable_mosaic.version = 11 : i64} {
  func.func @_combine_aligned_kernel(%arg0: i32, %arg1: memref<1x128xf32, #tpu.memory_space<vmem>>, %arg2: memref<16x128xf32, #tpu.memory_space<vmem>>, %arg3: memref<16x128xf32, #tpu.memory_space<vmem>>, %arg4: memref<16x256xf32, #tpu.memory_space<vmem>>) attributes {dimension_semantics = [#tpu.dimension_semantics<parallel>], iteration_bounds = array<i64: 1>, scalar_prefetch = 0 : i64, scratch_operands = 0 : i64, tpu.core_type = #tpu.core_type<tc>, window_params = [{pipeline_mode = #tpu.pipeline_mode<synchronous>, transform_indices = @transform_0, window_bounds = array<i64: 1, 128>}, {transform_indices = @transform_1, window_bounds = array<i64: 16, 128>}, {transform_indices = @transform_2, window_bounds = array<i64: 16, 128>}, {transform_indices = @transform_3, window_bounds = array<i64: 16, 256>}]} {
    %c0 = arith.constant 0 : index
    %c0_0 = arith.constant 0 : index
    %0 = vector.load %arg2[%c0, %c0_0] : memref<16x128xf32, #tpu.memory_space<vmem>>, vector<16x128xf32>
    %c0_1 = arith.constant 0 : index
    %c0_2 = arith.constant 0 : index
    %1 = vector.load %arg1[%c0_1, %c0_2] : memref<1x128xf32, #tpu.memory_space<vmem>>, vector<1x128xf32>
    %2 = vector.broadcast %1 : vector<1x128xf32> to vector<16x128xf32>
    %3 = arith.mulf %0, %2 : vector<16x128xf32>
    %c0_3 = arith.constant 0 : index
    %c0_4 = arith.constant 0 : index
    %4 = vector.load %arg4[%c0_3, %c0_4] : memref<16x256xf32, #tpu.memory_space<vmem>>, vector<16x128xf32>
    tpu.vector_store %arg4[%c0_3, %c0_4], %3 {strides = array<i32>} : memref<16x256xf32, #tpu.memory_space<vmem>>, vector<16x128xf32>,
    %c0_5 = arith.constant 0 : index
    %c0_6 = arith.constant 0 : index
    %5 = vector.load %arg3[%c0_5, %c0_6] : memref<16x128xf32, #tpu.memory_space<vmem>>, vector<16x128xf32>
    %c0_7 = arith.constant 0 : index
    %c128 = arith.constant 128 : index
    %6 = vector.load %arg4[%c0_7, %c128] : memref<16x256xf32, #tpu.memory_space<vmem>>, vector<16x128xf32>
    tpu.vector_store %arg4[%c0_7, %c128], %5 {strides = array<i32>} : memref<16x256xf32, #tpu.memory_space<vmem>>, vector<16x128xf32>,
    return
  }
  func.func @transform_0(%arg0: i32) -> (i32, i32) {
    %c0_i32 = arith.constant 0 : i32
    %c0_i32_0 = arith.constant 0 : i32
    %c0_i32_1 = arith.constant 0 : i32
    return %c0_i32, %c0_i32_0 : i32, i32
  }
  func.func @transform_1(%arg0: i32) -> (i32, i32) {
    %c0_i32 = arith.constant 0 : i32
    %c0_i32_0 = arith.constant 0 : i32
    return %arg0, %c0_i32 : i32, i32
  }
  func.func @transform_2(%arg0: i32) -> (i32, i32) {
    %c0_i32 = arith.constant 0 : i32
    %c0_i32_0 = arith.constant 0 : i32
    return %arg0, %c0_i32 : i32, i32
  }
  func.func @transform_3(%arg0: i32) -> (i32, i32) {
    %c0_i32 = arith.constant 0 : i32
    %c0_i32_0 = arith.constant 0 : i32
    return %arg0, %c0_i32 : i32, i32
  }
}

</mosaic_0001>

<bundles_post_ra>
// kernel: tpu_custom_call.1
= control target key start
LH: loop header
LB: loop body
LE: loop exit
PB: predicated region body
PF: predicated region fallthrough
CT: control target
= control target key end

     0   :  { %8 = vsyncpa [#allocation3], 0  ;;  %s274_s0 = inlined_call_operand.hbm [shape: f32[1,128], index: 0, kind: input, shape index: {}]   ;;  %s275_s1 = inlined_call_operand.hbm [shape: f32[16,128], index: 1, kind: input, shape index: {}]   ;;  %s276_s2 = inlined_call_operand.hbm [shape: f32[16,128], index: 2, kind: input, shape index: {}]   ;;  %s277_s3 = inlined_call_operand.hbm [shape: f32[16,256], index: 3, kind: output, shape index: {}]  }
   0x1   :  { %9 = vsyncpa [#allocation6], 0 }
   0x2   :  { %10 = vsyncpa [#allocation4], 0  ;;  %s192_s12 = smov [#allocation5]   ;;  %s98_s16 = scalar_lea.hbm %s275_s1, 256 }
   0x3   :  { %s26_s13 = sshll.u32 %s192_s12, 4  ;;  %p99_p0 = scmp.ne.s32.totalorder %s275_s1, %s98_s16  ;;  %s27_s13 = int_to_ptr.vmem [resolvable:$true] %s26_s13 }
   0x4   :  { %p102_p1 = scmp.lt.u32.totalorder %s98_s16, %s275_s1 }
   0x6   :  { %p104_p2 = pnand %p102_p1, %p99_p0 }
   0x8   :  { %107 = shalt.err (!%p104_p2)
}
   0x9   :  { %s108_s21 = scalar_lea.vmem %s27_s13, 256  ;;  %p113_p4 = scmp.lt.s32.totalorder %s27_s13, %s27_s13 }
   0xa   :  { %p109_p3 = scmp.ne.s32.totalorder %s27_s13, %s108_s21  ;;  %p114_p5 = scmp.lt.s32.totalorder %s108_s21, %s108_s21 }
   0xc   :  { %p115_p6 = por %p114_p5, %p113_p4 }
   0xe   :  { %p116_p7 = pnand %p115_p6, %p109_p3 }
  0x10   :  { %119 = shalt.err (!%p116_p7)
}
  0x11   :  { %s193_s22 = smov 128   ;;  %s194_s23 = smov 8  }
  0x12   :  { %32 = dma.hbm_to_vmem [thread:$0]  %s275_s1, 256, %s27_s13, [#allocation6], %s193_s22, %s193_s22, %s194_s23  }
  0x13   :  { %s195_s26 = smov [#allocation2]   ;;  %s196_s28 = smov [#allocation7]  }
  0x14   :  { %s17_s27 = sshll.u32 %s195_s26, 4  ;;  %s38_s29 = sshll.u32 %s196_s28, 4  ;;  %s18_s27 = int_to_ptr.vmem [resolvable:$true] %s17_s27  ;;  %s39_s29 = int_to_ptr.vmem [resolvable:$true] %s38_s29 }
  0x15   :  { %s120_s5 = scalar_lea.hbm %s274_s0, 16 }
  0x16   :  { %p121_p8 = scmp.ne.s32.totalorder %s274_s0, %s120_s5  ;;  %p124_p9 = scmp.lt.u32.totalorder %s120_s5, %s274_s0 }
  0x18   :  { %p126_p10 = pnand %p124_p9, %p121_p8 }
  0x1a   :  { %129 = shalt.err (!%p126_p10)
}
  0x1b   :  { %s130_s1 = scalar_lea.vmem %s18_s27, 16  ;;  %s134_s10 = scalar_lea.vmem %s18_s27, 32 }
  0x1c   :  { %p131_p11 = scmp.ne.s32.totalorder %s18_s27, %s130_s1  ;;  %p135_p12 = scmp.lt.s32.totalorder %s18_s27, %s18_s27 }
  0x1d   :  { %p136_p13 = scmp.lt.s32.totalorder %s134_s10, %s130_s1 }
  0x1f   :  { %p137_p0 = por %p136_p13, %p135_p12 }
  0x21   :  { %p138_p1 = pnand %p137_p0, %p131_p11 }
  0x23   :  { %141 = shalt.err (!%p138_p1)
}
  0x24   :  { %20 = dma.hbm_to_vmem [thread:$0]  %s274_s0, 16, %s18_s27, [#allocation3]  }
  0x25   :  { %s142_s15 = scalar_lea.hbm %s276_s2, 256 }
  0x26   :  { %p143_p2 = scmp.ne.s32.totalorder %s276_s2, %s142_s15  ;;  %p146_p3 = scmp.lt.u32.totalorder %s142_s15, %s276_s2 }
  0x28   :  { %p148_p4 = pnand %p146_p3, %p143_p2 }
  0x2a   :  { %151 = shalt.err (!%p148_p4)
}
  0x2b   :  { %s152_s20 = scalar_lea.vmem %s39_s29, 256  ;;  %p157_p6 = scmp.lt.s32.totalorder %s39_s29, %s39_s29 }
  0x2c   :  { %p153_p5 = scmp.ne.s32.totalorder %s39_s29, %s152_s20  ;;  %p158_p7 = scmp.lt.s32.totalorder %s152_s20, %s152_s20 }
  0x2e   :  { %p159_p8 = por %p158_p7, %p157_p6 }
  0x30   :  { %p160_p9 = pnand %p159_p8, %p153_p5 }
  0x32   :  { %163 = shalt.err (!%p160_p9)
}
  0x33   :  { %44 = dma.hbm_to_vmem [thread:$0]  %s276_s2, 256, %s39_s29, [#allocation6], %s193_s22, %s193_s22, %s194_s23  }
  0x34   :  { %186 = dma.done.wait [#allocation3], 16  }
  0x35   :  { %187 = vsyncadd [#allocation3], 4294967280 }
  0x36   :  { %188 = dma.done.wait [#allocation6], 512  }
  0x37   :  { %189 = vsyncadd [#allocation6], 4294966784  ;;  %s197_s24 = smov [#allocation8]   ;;  %v54_v0 = vld [vmem:[#allocation5] sm:$0xff]  ;;  %v89_v1 = vld [vmem:[#allocation2] ss:$0 sm:$0xff] }
  0x38   :  { %s76_s25 = sshll.u32 %s197_s24, 4  ;;  %v55_v2 = vld [vmem:[#allocation5 + $0x8] sm:$0xff]  ;;  %v63_v3 = vmul.f32 %v89_v1, %v54_v0  ;;  %v67_v5 = vld [vmem:[#allocation7] sm:$0xff]  ;;  %v68_v6 = vld [vmem:[#allocation7 + $0x8] sm:$0xff]  ;;  %s77_s25 = int_to_ptr.vmem [resolvable:$true] %s76_s25 }
  0x39   :  { %v64_v4 = vmul.f32 %v89_v1, %v55_v2  ;;  %69 = vst [vmem:[#allocation8 + $0x8] sm:$0xff] %v67_v5  ;;  %70 = vst [vmem:[#allocation8 + $0x18] sm:$0xff] %v68_v6  ;;  %s164_s26 = scalar_lea.vmem %s77_s25, 512  ;;  %p169_p11 = scmp.lt.s32.totalorder %s77_s25, %s77_s25 }
  0x3a   :  { %65 = vst [vmem:[#allocation8] sm:$0xff] %v63_v3  ;;  %p165_p10 = scmp.ne.s32.totalorder %s77_s25, %s164_s26  ;;  %p170_p12 = scmp.lt.s32.totalorder %s164_s26, %s164_s26 }
  0x3b   :  { %66 = vst [vmem:[#allocation8 + $0x10] sm:$0xff] %v64_v4 }
  0x3c   :  { %p171_p13 = por %p170_p12, %p169_p11 }
  0x3e   :  { %p172_p0 = pnand %p171_p13, %p165_p10 }
  0x40   :  { %175 = shalt.err (!%p172_p0)
}
  0x41   :  { %s176_s23 = scalar_lea.hbm %s277_s3, 512 }
  0x42   :  { %p177_p1 = scmp.ne.s32.totalorder %s277_s3, %s176_s23  ;;  %p180_p2 = scmp.lt.u32.totalorder %s176_s23, %s277_s3 }
  0x44   :  { %p182_p3 = pnand %p180_p2, %p177_p1 }
  0x46   :  { %185 = shalt.err (!%p182_p3)
}
  0x47   :  { %s198_s4 = smov 256   ;;  %s199_s5 = smov 16  }
  0x48   :  { %82 = dma.vmem_to_hbm [thread:$0]  %s77_s25, 512, %s277_s3, [#allocation4], %s198_s4, %s198_s4, %s199_s5  }
  0x49   :  { %190 = dma.done.wait [#allocation4], 512  }
  0x4a   :  { %191 = vsyncadd [#allocation4], 4294966784 }
  0x4b   :  { %86 = vsyncpa [#allocation3], 1 }
  0x4c   :  { %87 = vsyncpa [#allocation6], 1 }
  0x4d   :  { %88 = vsyncpa [#allocation4], 1 }

</bundles_post_ra>
